<compile_context>
chip_gen: v6e
topology: v6e:2x2x1
jax: 0.10.0
libtpu: 0.0.40
codegen_flags: <defaults>
</compile_context>

<pallas_src>
import jax
import jax.numpy as jnp
from jax.experimental import pallas as pl
from jax.experimental.pallas import tpu as pltpu

_LANES = 128
_SUBLANES = 8
# Target per-grid-step VMEM working set (in + out blocks, double buffered).
# 8 MiB fits every chip's default scoped VMEM (v5e 16 MiB, v6e/v7x 32 MiB).
_TARGET_WORKING_SET = 8 * 1024 * 1024
_MAX_BATCH_TILE = 32  # bound trace-time unrolling


def _round_up(x, m):
    return ((x + m - 1) // m) * m


def _hswish_conv1x1_kernel(x_ref, w_ref, b_ref, o_ref):
    """Fused 1x1 conv (3 -> 3 channels) + hard-swish-like epilogue.

    x_ref: VMEM (bn, 3, Hp, Wp) input block (already spatially zero-padded).
    w_ref: SMEM (3, 3) f32 conv weights (read as scalars).
    b_ref: SMEM (3,)  f32 constants = bias + 3 (the "+3" is pre-folded).
    o_ref: VMEM (bn, 3, Hp, Wp) output block.
    """
    bn = x_ref.shape[0]
    # Hoist the 12 scalar SMEM reads above the unrolled loops.
    w = [[w_ref[co, ci] for ci in range(3)] for co in range(3)]
    bb = [b_ref[c] for c in range(3)]
    inv6 = 1.0 / 6.0
    for b in range(bn):  # static unroll; channel planes are leading-dim slices
        x0 = x_ref[b, 0, :, :]
        x1 = x_ref[b, 1, :, :]
        x2 = x_ref[b, 2, :, :]
        for c in range(3):  # 9 VPU FMAs + epilogue per batch element
            v1 = w[c][0] * x0 + w[c][1] * x1 + w[c][2] * x2 + bb[c]
            v2 = jnp.clip(v1, 0.0, 6.0)
            o_ref[b, c, :, :] = v1 * v2 * inv6


def _pick_batch_tile(n, per_n_bytes):
    """Largest divisor of n whose working set fits; prefer >= 2 grid steps."""
    cap = max(1, min(_MAX_BATCH_TILE, _TARGET_WORKING_SET // max(per_n_bytes, 1)))
    divisors = [d for d in range(1, n + 1) if n % d == 0 and d <= cap]
    if not divisors:
        return 1
    bn = max(divisors)
    if n > 1 and bn == n:
        smaller = [d for d in divisors if d < n]
        if smaller:  # >= 2 grid steps -> both v7x TensorCores get work
            bn = max(smaller)
    return bn


@jax.jit
def model_forward(x_nchw, weight, bias):
    """x_nchw: (N, 3, H, W) f32. weight: (3, 3, 1, 1). bias: (3,)."""
    n, c_in, h, w = x_nchw.shape
    c_out = weight.shape[0]
    assert c_in == 3 and c_out == 3

    # padding=1 on a 1x1 conv: the border sees x = 0 -> conv there is just the
    # bias, so a single zero-pad reproduces it and the kernel stays elementwise.
    x_pad = jnp.pad(x_nchw, ((0, 0), (0, 0), (1, 1), (1, 1)))
    hp, wp = h + 2, w + 2

    w_mat = weight.reshape(c_out, c_in).astype(jnp.float32)
    b3 = bias.astype(jnp.float32) + 3.0   # fold the "+3" into the bias

    # VMEM footprint of one batch element's (3, Hp, Wp) f32 in+out blocks,
    # including (8, 128) tile padding, double buffered.
    per_n_bytes = 4 * (3 * _round_up(hp, _SUBLANES) * _round_up(wp, _LANES) * 4)
    bn = _pick_batch_tile(n, per_n_bytes)
    num_tiles = n // bn
    vmem_limit = int(min(64 * 1024 * 1024,
                         max(16 * 1024 * 1024, 2 * bn * per_n_bytes)))

    out = pl.pallas_call(
        _hswish_conv1x1_kernel,
        out_shape=jax.ShapeDtypeStruct((n, c_out, hp, wp), jnp.float32),
        grid_spec=pl.GridSpec(
            grid=(num_tiles,),
            in_specs=[
                pl.BlockSpec((bn, c_in, hp, wp), lambda i: (i, 0, 0, 0)),
                pl.BlockSpec(memory_space=pltpu.MemorySpace.SMEM),  # weights
                pl.BlockSpec(memory_space=pltpu.MemorySpace.SMEM),  # bias + 3
            ],
            out_specs=pl.BlockSpec((bn, c_out, hp, wp),
                                   lambda i: (i, 0, 0, 0)),
        ),
        compiler_params=pltpu.CompilerParams(
            dimension_semantics=("parallel",),
            vmem_limit_bytes=vmem_limit,
            # Let XLA fold the zero-pad producer into the Pallas input DMA.
            allow_input_fusion=[True, False, False],
        ),
    )(x_pad, w_mat, b3)
    return out  # (N, 3, H+2, W+2)


def _reference(x_nchw, weight, bias):
    x_pad = jnp.pad(x_nchw, ((0, 0), (0, 0), (1, 1), (1, 1)))
    conv = jnp.einsum("oc,nchw->nohw", weight.reshape(3, 3), x_pad)
    conv = conv + bias[None, :, None, None]
    v1 = 3.0 + conv
    v2 = jnp.clip(v1, 0.0, 6.0)
    return v1 * v2 / 6.0


if __name__ == "__main__":
    key = jax.random.PRNGKey(0)
    kx, kw, kb, kx2 = jax.random.split(key, 4)

    # Conv2d(3, 3, 1): weight (3,3,1,1), bias (3,) — deterministic init.
    fan_in = 3 * 1 * 1
    bound = 1.0 / (fan_in ** 0.5)
    weight = jax.random.uniform(kw, (3, 3, 1, 1), jnp.float32, -bound, bound)
    bias = jax.random.uniform(kb, (3,), jnp.float32, -bound, bound)

    # Spec shape (1, 3, 64, 64): single-step grid.
    x = jax.random.normal(kx, (1, 3, 64, 64), dtype=jnp.float32)
    out = jax.block_until_ready(model_forward(x, weight, bias))
    assert out.shape == (1, 3, 66, 66), out.shape
    assert jnp.allclose(out, _reference(x, weight, bias), atol=1e-5, rtol=1e-5)

    # Larger batch exercises the multi-step ("parallel") grid path (bn=8, 2 steps).
    x2 = jax.random.normal(kx2, (16, 3, 64, 64), dtype=jnp.float32)
    out2 = jax.block_until_ready(model_forward(x2, weight, bias))
    assert out2.shape == (16, 3, 66, 66), out2.shape
    assert jnp.allclose(out2, _reference(x2, weight, bias),
                        atol=1e-5, rtol=1e-5)

    print("KERNEL_OK")
</pallas_src>

<mosaic_0001>
module attributes {stable_mosaic.version = 11 : i64} {
  func.func @_hswish_conv1x1_kernel(%arg0: i32, %arg1: memref<1x3x66x66xf32, #tpu.memory_space<vmem>>, %arg2: memref<3x3xf32, #tpu.memory_space<smem>>, %arg3: memref<3xf32, #tpu.memory_space<smem>>, %arg4: memref<1x3x66x66xf32, #tpu.memory_space<vmem>>) attributes {dimension_semantics = [#tpu.dimension_semantics<parallel>], iteration_bounds = array<i64: 1>, scalar_prefetch = 0 : i64, scratch_operands = 0 : i64, tpu.core_type = #tpu.core_type<tc>, window_params = [{transform_indices = @transform_0, window_bounds = array<i64: 1, 3, 66, 66>}, {transform_indices = @transform_1, window_bounds = array<i64: 3, 3>}, {transform_indices = @transform_2, window_bounds = array<i64: 3>}, {transform_indices = @transform_3, window_bounds = array<i64: 1, 3, 66, 66>}]} {
    %c0 = arith.constant 0 : index
    %c0_0 = arith.constant 0 : index
    %0 = memref.load %arg2[%c0, %c0_0] : memref<3x3xf32, #tpu.memory_space<smem>>
    %c0_1 = arith.constant 0 : index
    %c1 = arith.constant 1 : index
    %1 = memref.load %arg2[%c0_1, %c1] : memref<3x3xf32, #tpu.memory_space<smem>>
    %c0_2 = arith.constant 0 : index
    %c2 = arith.constant 2 : index
    %2 = memref.load %arg2[%c0_2, %c2] : memref<3x3xf32, #tpu.memory_space<smem>>
    %c1_3 = arith.constant 1 : index
    %c0_4 = arith.constant 0 : index
    %3 = memref.load %arg2[%c1_3, %c0_4] : memref<3x3xf32, #tpu.memory_space<smem>>
    %c1_5 = arith.constant 1 : index
    %c1_6 = arith.constant 1 : index
    %4 = memref.load %arg2[%c1_5, %c1_6] : memref<3x3xf32, #tpu.memory_space<smem>>
    %c1_7 = arith.constant 1 : index
    %c2_8 = arith.constant 2 : index
    %5 = memref.load %arg2[%c1_7, %c2_8] : memref<3x3xf32, #tpu.memory_space<smem>>
    %c2_9 = arith.constant 2 : index
    %c0_10 = arith.constant 0 : index
    %6 = memref.load %arg2[%c2_9, %c0_10] : memref<3x3xf32, #tpu.memory_space<smem>>
    %c2_11 = arith.constant 2 : index
    %c1_12 = arith.constant 1 : index
    %7 = memref.load %arg2[%c2_11, %c1_12] : memref<3x3xf32, #tpu.memory_space<smem>>
    %c2_13 = arith.constant 2 : index
    %c2_14 = arith.constant 2 : index
    %8 = memref.load %arg2[%c2_13, %c2_14] : memref<3x3xf32, #tpu.memory_space<smem>>
    %c0_15 = arith.constant 0 : index
    %9 = memref.load %arg3[%c0_15] : memref<3xf32, #tpu.memory_space<smem>>
    %c1_16 = arith.constant 1 : index
    %10 = memref.load %arg3[%c1_16] : memref<3xf32, #tpu.memory_space<smem>>
    %c2_17 = arith.constant 2 : index
    %11 = memref.load %arg3[%c2_17] : memref<3xf32, #tpu.memory_space<smem>>
    %c0_18 = arith.constant 0 : index
    %c0_19 = arith.constant 0 : index
    %c0_20 = arith.constant 0 : index
    %c0_21 = arith.constant 0 : index
    %12 = vector.load %arg1[%c0_18, %c0_19, %c0_20, %c0_21] : memref<1x3x66x66xf32, #tpu.memory_space<vmem>>, vector<1x1x66x66xf32>
    %13 = vector.shape_cast %12 : vector<1x1x66x66xf32> to vector<66x66xf32>
    %c0_22 = arith.constant 0 : index
    %c1_23 = arith.constant 1 : index
    %c0_24 = arith.constant 0 : index
    %c0_25 = arith.constant 0 : index
    %14 = vector.load %arg1[%c0_22, %c1_23, %c0_24, %c0_25] : memref<1x3x66x66xf32, #tpu.memory_space<vmem>>, vector<1x1x66x66xf32>
    %15 = vector.shape_cast %14 : vector<1x1x66x66xf32> to vector<66x66xf32>
    %c0_26 = arith.constant 0 : index
    %c2_27 = arith.constant 2 : index
    %c0_28 = arith.constant 0 : index
    %c0_29 = arith.constant 0 : index
    %16 = vector.load %arg1[%c0_26, %c2_27, %c0_28, %c0_29] : memref<1x3x66x66xf32, #tpu.memory_space<vmem>>, vector<1x1x66x66xf32>
    %17 = vector.shape_cast %16 : vector<1x1x66x66xf32> to vector<66x66xf32>
    %18 = vector.broadcast %0 : f32 to vector<66x66xf32>
    %19 = arith.mulf %18, %13 : vector<66x66xf32>
    %20 = vector.broadcast %1 : f32 to vector<66x66xf32>
    %21 = arith.mulf %20, %15 : vector<66x66xf32>
    %22 = arith.addf %19, %21 : vector<66x66xf32>
    %23 = vector.broadcast %2 : f32 to vector<66x66xf32>
    %24 = arith.mulf %23, %17 : vector<66x66xf32>
    %25 = arith.addf %22, %24 : vector<66x66xf32>
    %26 = vector.broadcast %9 : f32 to vector<66x66xf32>
    %27 = arith.addf %25, %26 : vector<66x66xf32>
    %cst = arith.constant 0.000000e+00 : f32
    %cst_30 = arith.constant 6.000000e+00 : f32
    %28 = vector.broadcast %cst : f32 to vector<66x66xf32>
    %29 = arith.maximumf %28, %27 : vector<66x66xf32>
    %30 = vector.broadcast %cst_30 : f32 to vector<66x66xf32>
    %31 = arith.minimumf %30, %29 : vector<66x66xf32>
    %32 = arith.mulf %27, %31 : vector<66x66xf32>
    %cst_31 = arith.constant 0.166666672 : f32
    %33 = vector.broadcast %cst_31 : f32 to vector<66x66xf32>
    %34 = arith.mulf %32, %33 : vector<66x66xf32>
    %c0_32 = arith.constant 0 : index
    %c0_33 = arith.constant 0 : index
    %c0_34 = arith.constant 0 : index
    %c0_35 = arith.constant 0 : index
    %35 = vector.load %arg4[%c0_32, %c0_33, %c0_34, %c0_35] : memref<1x3x66x66xf32, #tpu.memory_space<vmem>>, vector<1x1x66x66xf32>
    %36 = vector.shape_cast %35 : vector<1x1x66x66xf32> to vector<66x66xf32>
    %37 = vector.shape_cast %34 : vector<66x66xf32> to vector<1x1x66x66xf32>
    tpu.vector_store %arg4[%c0_32, %c0_33, %c0_34, %c0_35], %37 {strides = array<i32>} : memref<1x3x66x66xf32, #tpu.memory_space<vmem>>, vector<1x1x66x66xf32>,
    %38 = vector.broadcast %3 : f32 to vector<66x66xf32>
    %39 = arith.mulf %38, %13 : vector<66x66xf32>
    %40 = vector.broadcast %4 : f32 to vector<66x66xf32>
    %41 = arith.mulf %40, %15 : vector<66x66xf32>
    %42 = arith.addf %39, %41 : vector<66x66xf32>
    %43 = vector.broadcast %5 : f32 to vector<66x66xf32>
    %44 = arith.mulf %43, %17 : vector<66x66xf32>
    %45 = arith.addf %42, %44 : vector<66x66xf32>
    %46 = vector.broadcast %10 : f32 to vector<66x66xf32>
    %47 = arith.addf %45, %46 : vector<66x66xf32>
    %cst_36 = arith.constant 0.000000e+00 : f32
    %cst_37 = arith.constant 6.000000e+00 : f32
    %48 = vector.broadcast %cst_36 : f32 to vector<66x66xf32>
    %49 = arith.maximumf %48, %47 : vector<66x66xf32>
    %50 = vector.broadcast %cst_37 : f32 to vector<66x66xf32>
    %51 = arith.minimumf %50, %49 : vector<66x66xf32>
    %52 = arith.mulf %47, %51 : vector<66x66xf32>
    %cst_38 = arith.constant 0.166666672 : f32
    %53 = vector.broadcast %cst_38 : f32 to vector<66x66xf32>
    %54 = arith.mulf %52, %53 : vector<66x66xf32>
    %c0_39 = arith.constant 0 : index
    %c1_40 = arith.constant 1 : index
    %c0_41 = arith.constant 0 : index
    %c0_42 = arith.constant 0 : index
    %55 = vector.load %arg4[%c0_39, %c1_40, %c0_41, %c0_42] : memref<1x3x66x66xf32, #tpu.memory_space<vmem>>, vector<1x1x66x66xf32>
    %56 = vector.shape_cast %55 : vector<1x1x66x66xf32> to vector<66x66xf32>
    %57 = vector.shape_cast %54 : vector<66x66xf32> to vector<1x1x66x66xf32>
    tpu.vector_store %arg4[%c0_39, %c1_40, %c0_41, %c0_42], %57 {strides = array<i32>} : memref<1x3x66x66xf32, #tpu.memory_space<vmem>>, vector<1x1x66x66xf32>,
    %58 = vector.broadcast %6 : f32 to vector<66x66xf32>
    %59 = arith.mulf %58, %13 : vector<66x66xf32>
    %60 = vector.broadcast %7 : f32 to vector<66x66xf32>
    %61 = arith.mulf %60, %15 : vector<66x66xf32>
    %62 = arith.addf %59, %61 : vector<66x66xf32>
    %63 = vector.broadcast %8 : f32 to vector<66x66xf32>
    %64 = arith.mulf %63, %17 : vector<66x66xf32>
    %65 = arith.addf %62, %64 : vector<66x66xf32>
    %66 = vector.broadcast %11 : f32 to vector<66x66xf32>
    %67 = arith.addf %65, %66 : vector<66x66xf32>
    %cst_43 = arith.constant 0.000000e+00 : f32
    %cst_44 = arith.constant 6.000000e+00 : f32
    %68 = vector.broadcast %cst_43 : f32 to vector<66x66xf32>
    %69 = arith.maximumf %68, %67 : vector<66x66xf32>
    %70 = vector.broadcast %cst_44 : f32 to vector<66x66xf32>
    %71 = arith.minimumf %70, %69 : vector<66x66xf32>
    %72 = arith.mulf %67, %71 : vector<66x66xf32>
    %cst_45 = arith.constant 0.166666672 : f32
    %73 = vector.broadcast %cst_45 : f32 to vector<66x66xf32>
    %74 = arith.mulf %72, %73 : vector<66x66xf32>
    %c0_46 = arith.constant 0 : index
    %c2_47 = arith.constant 2 : index
    %c0_48 = arith.constant 0 : index
    %c0_49 = arith.constant 0 : index
    %75 = vector.load %arg4[%c0_46, %c2_47, %c0_48, %c0_49] : memref<1x3x66x66xf32, #tpu.memory_space<vmem>>, vector<1x1x66x66xf32>
    %76 = vector.shape_cast %75 : vector<1x1x66x66xf32> to vector<66x66xf32>
    %77 = vector.shape_cast %74 : vector<66x66xf32> to vector<1x1x66x66xf32>
    tpu.vector_store %arg4[%c0_46, %c2_47, %c0_48, %c0_49], %77 {strides = array<i32>} : memref<1x3x66x66xf32, #tpu.memory_space<vmem>>, vector<1x1x66x66xf32>,
    return
  }
  func.func @transform_0(%arg0: i32) -> (i32, i32, i32, i32) {
    %c0_i32 = arith.constant 0 : i32
    %c0_i32_0 = arith.constant 0 : i32
    %c0_i32_1 = arith.constant 0 : i32
    %c0_i32_2 = arith.constant 0 : i32
    return %arg0, %c0_i32, %c0_i32_0, %c0_i32_1 : i32, i32, i32, i32
  }
  func.func @transform_1(%arg0: i32) -> (i32, i32) {
    %c0_i32 = arith.constant 0 : i32
    %c0_i32_0 = arith.constant 0 : i32
    %c0_i32_1 = arith.constant 0 : i32
    return %c0_i32, %c0_i32_0 : i32, i32
  }
  func.func @transform_2(%arg0: i32) -> i32 {
    %c0_i32 = arith.constant 0 : i32
    %c0_i32_0 = arith.constant 0 : i32
    return %c0_i32 : i32
  }
  func.func @transform_3(%arg0: i32) -> (i32, i32, i32, i32) {
    %c0_i32 = arith.constant 0 : i32
    %c0_i32_0 = arith.constant 0 : i32
    %c0_i32_1 = arith.constant 0 : i32
    %c0_i32_2 = arith.constant 0 : i32
    return %arg0, %c0_i32, %c0_i32_0, %c0_i32_1 : i32, i32, i32, i32
  }
}

</mosaic_0001>

<bundles_post_ra>
// kernel: model_forward.2
= control target key start
LH: loop header
LB: loop body
LE: loop exit
PB: predicated region body
PF: predicated region fallthrough
CT: control target
= control target key end

     0   :  { %s1677_s0 = inlined_call_operand.vmem [shape: f32[3,3], index: 0, kind: input, shape index: {}]   ;;  %s1678_s1 = inlined_call_operand.vmem [shape: f32[3], index: 1, kind: input, shape index: {}]   ;;  %s1679_s2 = inlined_call_operand.hbm [shape: f32[1,3,64,64], index: 2, kind: input, shape index: {}]   ;;  %s1680_s3 = inlined_call_operand.<no memory space> [shape: f32[], index: 3, kind: input, shape index: {}]   ;;  %s1681_s4 = inlined_call_operand.vmem [shape: f32[1,3,66,66], index: 4, kind: output, shape index: {}]  }
   0x1   :  { %v1111_v0 = vstv %s1680_s3 }
   0x2   :  { %10 = vsyncpa [#allocation8], 0 }
   0x3   :  { %11 = vsyncpa [#allocation9], 0 }
   0x4   :  { %12 = vsyncpa [#allocation12], 0 }
   0x5   :  { %20 = vsyncadd [#allocation8], 384  ;;  %s32_s17 = sld [smem:[#allocation0]]   ;;  %s1073_s18 = smov [#allocation7 + $0x8]  }
   0x6   :  { %s40_s19 = sshll.u32 %s1073_s18, 4  ;;  %s1074_s20 = smov 1024   ;;  %s41_s19 = int_to_ptr.vmem [resolvable:$true] %s40_s19 }
   0x7   :  { %47 = sst [smem:[#allocation14]] %s1074_s20  ;;  %s1075_s21 = smov 1152  }
   0x8   :  { %49 = sst [smem:[#allocation14 + $0x1]] %s1075_s21  ;;  %s1076_s22 = smov 8  }
   0x9   :  { %51 = sst [smem:[#allocation14 + $0x2]] %s1076_s22  ;;  %s1077_s24 = smov 128  }
   0xa   :  { %53 = sst [smem:[#allocation14 + $0x3]] %s1077_s24  ;;  %s1078_s3 = smov [#allocation8]  }
   0xb   :  { %s1003_s23 = sshll.u32 %s32_s17, 26  ;;  %55 = sst [smem:[#allocation14 + $0x4]] %s1077_s24 }
   0xc   :  { %s1004_s25 = sadd.s32 134217728, %s1003_s23  ;;  %57 = sst [smem:[#allocation14 + $0x5]] %s1076_s22 }
   0xd   :  { %s1079_s26 = smov 131072   ;;  %s66_s5 = sshll.u32 %s1677_s0, 4  ;;  %s67_s5 = int_to_ptr.vmem [resolvable:$true] %s66_s5 }
   0xe   :  { %59 = dma.general %s1679_s2, 3072, %s41_s19, %s1078_s3, %s1079_s26, [#allocation14], %s1004_s25, 0  }
   0xf   :  { %s76_s8 = sshll.u32 %s1678_s1, 4  ;;  %s1043_s9 = scalar_lea.vmem %s67_s5, 64  ;;  %s77_s8 = int_to_ptr.vmem [resolvable:$true] %s76_s8 }
  0x10   :  { %p1044_p0 = scmp.ne.s32.totalorder %s67_s5, %s1043_s9  ;;  %p1048_p1 = scmp.lt.s32.totalorder %s67_s5, %s67_s5 }
  0x11   :  { %p1049_p2 = scmp.lt.s32.totalorder %s1043_s9, %s1043_s9 }
  0x13   :  { %p1050_p3 = por %p1049_p2, %p1048_p1 }
  0x15   :  { %p1051_p4 = pnand %p1050_p3, %p1044_p0 }
  0x17   :  { %1054 = shalt.err (!%p1051_p4)
}
  0x18   :  { %s1080_s10 = smov [#allocation10]   ;;  %s1055_s2 = scalar_lea.vmem %s77_s8, 16 }
  0x19   :  { %69 = dma.vmem_to_smem %s67_s5, 64, %s1080_s10, [#allocation9]  }
  0x1a   :  { %p1056_p5 = scmp.ne.s32.totalorder %s77_s8, %s1055_s2  ;;  %p1060_p6 = scmp.lt.s32.totalorder %s77_s8, %s77_s8 }
  0x1b   :  { %p1061_p7 = scmp.lt.s32.totalorder %s1055_s2, %s1055_s2 }
  0x1d   :  { %p1062_p8 = por %p1061_p7, %p1060_p6 }
  0x1f   :  { %p1063_p9 = pnand %p1062_p8, %p1056_p5 }
  0x21   :  { %1066 = shalt.err (!%p1063_p9)
}
  0x22   :  { %s1081_s0 = smov [#allocation11]  }
  0x23   :  { %79 = dma.vmem_to_smem %s77_s8, 16, %s1081_s0, [#allocation12]  }
  0x24   :  { %1067 = dma.done.wait [#allocation8], 3456  }
  0x25   :  { %1068 = vsyncadd [#allocation8], 4294963840 }
  0x26   :  { %1069 = dma.done.wait [#allocation9], 64  }
  0x27   :  { %1070 = vsyncadd [#allocation9], 4294967232 }
  0x28   :  { %1071 = dma.done.wait [#allocation12], 16  }
  0x29   :  { %1072 = vsyncadd [#allocation12], 4294967280 }
  0x2a   :  { %89 = sfence }
  0x2b   :  { %v97_v1 = vlaneseq  ;;  %v115_v3 = vld [vmem:[#allocation7 + $0x10] sm:$0xff]  ;;  %v136_v5 = vld [vmem:[#allocation7 + $0x18] sm:$0xff]  ;;  %v95_v6 = vld [vmem:[#allocation7 + $0x8] sm:$0xff]  ;;  %vm102_vm0 = vcmask 1046528   ;;  %s1082_s1 = smov 1   ;;  %s642_s11 = sld [smem:[#allocation10]] }
  0x2c   :  { %v157_v7 = vld [vmem:[#allocation7 + $0x20] sm:$0xff]  ;;  %v178_v12 = vld [vmem:[#allocation7 + $0x28] sm:$0xff]  ;;  %v199_v13 = vld [vmem:[#allocation7 + $0x30] sm:$0xff]  ;;  %s1007_s12 = sld [smem:[#allocation10 + $0x80]]  ;;  %vm777_vm3 = vcmask 539648   ;;  %vm786_vm4 = vcmask 533504  }
  0x2d   :  { %v1122_v2 = vand.u32 127, %v97_v1  ;;  %v220_v18 = vld [vmem:[#allocation7 + $0x38] sm:$0xff]  ;;  %v241_v19 = vld [vmem:[#allocation7 + $0x40] sm:$0xff]  ;;  %v277_v32 = vld [vmem:[#allocation7 + $0x50] sm:$0xff]  ;;  %s1010_s13 = sld [smem:[#allocation10 + $0x100]] }
  0x2e   :  { %v299_v40 = vld [vmem:[#allocation7 + $0x58] sm:$0xff]  ;;  %v320_v41 = vld [vmem:[#allocation7 + $0x60] sm:$0xff]  ;;  %v341_v50 = vld [vmem:[#allocation7 + $0x68] sm:$0xff]  ;;  %s1005_s14 = sld [smem:[#allocation10 + $0x1]] }
  0x2f   :  { %v1125_v4 = vadd.s32 128, %v1122_v2  ;;  %vm107_vm2 = vcmp.lt.s32.totalorder %v1122_v2, 127  ;;  %v362_v51 = vld [vmem:[#allocation7 + $0x70] sm:$0xff]  ;;  %v383_v60 = vld [vmem:[#allocation7 + $0x78] sm:$0xff]  ;;  %v404_v61 = vld [vmem:[#allocation7 + $0x80] sm:$0xff]  ;;  %s1008_s15 = sld [smem:[#allocation10 + $0x81]] }
  0x30   :  { %s1011_s16 = sld [smem:[#allocation10 + $0x101]] }
  0x31   :  { %vm100_vm1 = vcmp.lt.s32.totalorder %v1125_v4, 192  ;;  %s1006_s17 = sld [smem:[#allocation10 + $0x2]] }
  0x32   :  { %v121_v8 = vsel %vm100_vm1, %v115_v3, %v1111_v0  ;;  %v142_v9 = vsel %vm100_vm1, %v136_v5, %v1111_v0  ;;  %v101_v10 = vsel %vm100_vm1, %v95_v6, %v1111_v0  ;;  %v163_v11 = vsel %vm100_vm1, %v157_v7, %v1111_v0  ;;  %s1009_s18 = sld [smem:[#allocation10 + $0x82]] }
  0x33   :  { %v144_v14 = vsel %vm102_vm0, %v142_v9, %v121_v8  ;;  %v103_v15 = vsel %vm102_vm0, %v101_v10, %v1111_v0  ;;  %v165_v16 = vsel %vm102_vm0, %v163_v11, %v142_v9  ;;  %v123_v17 = vsel %vm102_vm0, %v121_v8, %v101_v10  ;;  %v425_v9 = vld [vmem:[#allocation7 + $0x88] sm:$0xff]  ;;  %s1012_s19 = sld [smem:[#allocation10 + $0x102]] }
  0x34   :  { %v145_v20 = vrot.slane %v144_v14, 7  ;;  %v104_v21 = vrot.slane %v103_v15, 7  ;;  %v166_v22 = vrot.slane %v165_v16, 7  ;;  %v124_v23 = vrot.slane %v123_v17, 7  ;;  %v461_v17 = vld [vmem:[#allocation7 + $0x98] sm:$0xff]  ;;  %s651_s20 = sld [smem:[#allocation11]] }
  0x35   :  { %v184_v24 = vsel %vm100_vm1, %v178_v12, %v1111_v0  ;;  %v205_v25 = vsel %vm100_vm1, %v199_v13, %v1111_v0  ;;  %v226_v28 = vsel %vm100_vm1, %v220_v18, %v1111_v0  ;;  %v247_v29 = vsel %vm100_vm1, %v241_v19, %v1111_v0  ;;  %v483_v18 = vld [vmem:[#allocation7 + $0xa0] sm:$0xff]  ;;  %s1013_s21 = sld [smem:[#allocation11 + $0x1]] }
  0x36   :  { %v149_v26 = vsel %vm107_vm2, %v145_v20, %v1111_v0  ;;  %v108_v27 = vsel %vm107_vm2, %v104_v21, %v1111_v0  ;;  %v207_v30 = vsel %vm102_vm0, %v205_v25, %v184_v24  ;;  %v186_v31 = vsel %vm102_vm0, %v184_v24, %v163_v11  ;;  %s1014_s22 = sld [smem:[#allocation11 + $0x2]] }
  0x37   :  { %150 = vrot.lane.b32.xlu1 %v149_v26, %s1082_s1  ;;  %109 = vrot.lane.b32.xlu0 %v108_v27, %s1082_s1  ;;  %v170_v33 = vsel %vm107_vm2, %v166_v22, %v1111_v0  ;;  %v128_v34 = vsel %vm107_vm2, %v124_v23, %v1111_v0  ;;  %v208_v35 = vrot.slane %v207_v30, 7  ;;  %v187_v36 = vrot.slane %v186_v31, 7  ;;  %v504_v27 = vld [vmem:[#allocation7 + $0xa8] sm:$0xff] }
  0x38   :  { %v249_v37 = vsel %vm102_vm0, %v247_v29, %v226_v28  ;;  %v228_v38 = vsel %vm102_vm0, %v226_v28, %v205_v25  ;;  %v284_v39 = vsel %vm100_vm1, %v277_v32, %v1111_v0  ;;  %v262_v47 = vsel %vm102_vm0, %v1111_v0, %v247_v29  ;;  %v525_v28 = vld [vmem:[#allocation7 + $0xb0] sm:$0xff] }
  0x39   :  { %v212_v42 = vsel %vm107_vm2, %v208_v35, %v1111_v0  ;;  %v191_v43 = vsel %vm107_vm2, %v187_v36, %v1111_v0  ;;  %v250_v44 = vrot.slane %v249_v37, 7  ;;  %v229_v45 = vrot.slane %v228_v38, 7  ;;  %v546_v37 = vld [vmem:[#allocation7 + $0xb8] sm:$0xff]  ;;  %v567_v38 = vld [vmem:[#allocation7 + $0xc0] sm:$0xff] }
  0x3a   :  { %v286_v46 = vsel %vm102_vm0, %v284_v39, %v1111_v0  ;;  %v305_v48 = vsel %vm100_vm1, %v299_v40, %v1111_v0  ;;  %v326_v49 = vsel %vm100_vm1, %v320_v41, %v1111_v0  ;;  %v263_v55 = vrot.slane %v262_v47, 7  ;;  %v588_v47 = vld [vmem:[#allocation7 + $0xc8] sm:$0xff] }
  0x3b   :  { %171 = vrot.lane.b32.xlu1 %v170_v33, %s1082_s1  ;;  %129 = vrot.lane.b32.xlu0 %v128_v34, %s1082_s1  ;;  %v254_v52 = vsel %vm107_vm2, %v250_v44, %v1111_v0  ;;  %v233_v53 = vsel %vm107_vm2, %v229_v45, %v1111_v0  ;;  %v287_v54 = vrot.slane %v286_v46, 7  ;;  %v328_v56 = vsel %vm102_vm0, %v326_v49, %v305_v48 }
  0x3c   :  { %v307_v57 = vsel %vm102_vm0, %v305_v48, %v284_v39  ;;  %v347_v58 = vsel %vm100_vm1, %v341_v50, %v1111_v0  ;;  %v368_v59 = vsel %vm100_vm1, %v362_v51, %v1111_v0  ;;  %v267_v63 = vsel %vm107_vm2, %v263_v55, %v1111_v0  ;;  %v609_v48 = vld [vmem:[#allocation7 + $0xd0] sm:$0xff] }
  0x3d   :  { %v291_v62 = vsel %vm107_vm2, %v287_v54, %v1111_v0  ;;  %v329_v1 = vrot.slane %v328_v56, 7  ;;  %v308_v3 = vrot.slane %v307_v57, 7  ;;  %v370_v5 = vsel %vm102_vm0, %v368_v59, %v347_v58 }
  0x3e   :  { %v349_v6 = vsel %vm102_vm0, %v347_v58, %v326_v49  ;;  %v389_v7 = vsel %vm100_vm1, %v383_v60, %v1111_v0  ;;  %v410_v8 = vsel %vm100_vm1, %v404_v61, %v1111_v0  ;;  %v371_v12 = vrot.slane %v370_v5, 7 }
  0x3f   :  { %213 = vrot.lane.b32.xlu1 %v212_v42, %s1082_s1  ;;  %192 = vrot.lane.b32.xlu0 %v191_v43, %s1082_s1  ;;  %v333_v10 = vsel %vm107_vm2, %v329_v1, %v1111_v0  ;;  %v312_v11 = vsel %vm107_vm2, %v308_v3, %v1111_v0  ;;  %v350_v13 = vrot.slane %v349_v6, 7  ;;  %v412_v14 = vsel %vm102_vm0, %v410_v8, %v389_v7 }
  0x40   :  { %v391_v15 = vsel %vm102_vm0, %v389_v7, %v368_v59  ;;  %v431_v16 = vsel %vm100_vm1, %v425_v9, %v1111_v0  ;;  %v375_v19 = vsel %vm107_vm2, %v371_v12, %v1111_v0  ;;  %v413_v21 = vrot.slane %v412_v14, 7 }
  0x41   :  { %v354_v20 = vsel %vm107_vm2, %v350_v13, %v1111_v0  ;;  %v392_v22 = vrot.slane %v391_v15, 7  ;;  %v446_v23 = vsel %vm102_vm0, %v1111_v0, %v431_v16  ;;  %v433_v24 = vsel %vm102_vm0, %v431_v16, %v410_v8 }
  0x42   :  { %v468_v25 = vsel %vm100_vm1, %v461_v17, %v1111_v0  ;;  %v489_v26 = vsel %vm100_vm1, %v483_v18, %v1111_v0  ;;  %v417_v29 = vsel %vm107_vm2, %v413_v21, %v1111_v0  ;;  %v447_v31 = vrot.slane %v446_v23, 7 }
  0x43   :  { %255 = vrot.lane.b32.xlu1 %v254_v52, %s1082_s1  ;;  %234 = vrot.lane.b32.xlu0 %v233_v53, %s1082_s1  ;;  %v396_v30 = vsel %vm107_vm2, %v392_v22, %v1111_v0  ;;  %v434_v32 = vrot.slane %v433_v24, 7  ;;  %v491_v33 = vsel %vm102_vm0, %v489_v26, %v468_v25  ;;  %v470_v34 = vsel %vm102_vm0, %v468_v25, %v1111_v0 }
  0x44   :  { %v510_v35 = vsel %vm100_vm1, %v504_v27, %v1111_v0  ;;  %v531_v36 = vsel %vm100_vm1, %v525_v28, %v1111_v0  ;;  %v451_v39 = vsel %vm107_vm2, %v447_v31, %v1111_v0  ;;  %v492_v41 = vrot.slane %v491_v33, 7 }
  0x45   :  { %v438_v40 = vsel %vm107_vm2, %v434_v32, %v1111_v0  ;;  %v471_v42 = vrot.slane %v470_v34, 7  ;;  %v533_v43 = vsel %vm102_vm0, %v531_v36, %v510_v35  ;;  %v512_v44 = vsel %vm102_vm0, %v510_v35, %v489_v26 }
  0x46   :  { %v552_v45 = vsel %vm100_vm1, %v546_v37, %v1111_v0  ;;  %v573_v46 = vsel %vm100_vm1, %v567_v38, %v1111_v0  ;;  %v496_v49 = vsel %vm107_vm2, %v492_v41, %v1111_v0  ;;  %v534_v51 = vrot.slane %v533_v43, 7 }
  0x47   :  { %292 = vrot.lane.b32.xlu1 %v291_v62, %s1082_s1  ;;  %268 = vrot.lane.b32.xlu0 %v267_v63, %s1082_s1  ;;  %v475_v50 = vsel %vm107_vm2, %v471_v42, %v1111_v0  ;;  %v513_v52 = vrot.slane %v512_v44, 7  ;;  %v575_v53 = vsel %vm102_vm0, %v573_v46, %v552_v45  ;;  %v554_v54 = vsel %vm102_vm0, %v552_v45, %v531_v36 }
  0x48   :  { %v594_v55 = vsel %vm100_vm1, %v588_v47, %v1111_v0  ;;  %v615_v56 = vsel %vm100_vm1, %v609_v48, %v1111_v0  ;;  %v538_v57 = vsel %vm107_vm2, %v534_v51, %v1111_v0  ;;  %v576_v59 = vrot.slane %v575_v53, 7 }
  0x49   :  { %v517_v58 = vsel %vm107_vm2, %v513_v52, %v1111_v0  ;;  %v555_v60 = vrot.slane %v554_v54, 7  ;;  %v617_v61 = vsel %vm102_vm0, %v615_v56, %v594_v55  ;;  %v596_v62 = vsel %vm102_vm0, %v594_v55, %v573_v46 }
  0x4a   :  { %v580_v4 = vsel %vm107_vm2, %v576_v59, %v1111_v0  ;;  %v618_v1 = vrot.slane %v617_v61, 7  ;;  %v597_v3 = vrot.slane %v596_v62, 7  ;;  %v630_v5 = vsel %vm102_vm0, %v1111_v0, %v615_v56 }
  0x4b   :  { %334 = vrot.lane.b32.xlu1 %v333_v10, %s1082_s1  ;;  %313 = vrot.lane.b32.xlu0 %v312_v11, %s1082_s1  ;;  %v559_v63 = vsel %vm107_vm2, %v555_v60, %v1111_v0  ;;  %v631_v8 = vrot.slane %v630_v5, 7  ;;  %v1342_v16 = vstv %s642_s11  ;;  %v1344_v17 = vstv %s1007_s12 }
  0x4c   :  { %v622_v6 = vsel %vm107_vm2, %v618_v1, %v1111_v0  ;;  %v601_v7 = vsel %vm107_vm2, %v597_v3, %v1111_v0  ;;  %v1348_v21 = vstv %s1005_s14  ;;  %v1350_v22 = vstv %s1008_s15 }
  0x4d   :  { %v635_v9 = vsel %vm107_vm2, %v631_v8, %v1111_v0  ;;  %v1352_v23 = vstv %s1011_s16  ;;  %v1354_v24 = vstv %s1006_s17  ;;  %v1356_v25 = vstv %s651_s20 }
  0x4e   :  { %v1358_v26 = vstv %s1009_s18  ;;  %v1360_v27 = vstv %s1012_s19  ;;  %v1366_v31 = vstv %s1014_s22 }
  0x4f   :  { %376 = vrot.lane.b32.xlu1 %v375_v19, %s1082_s1  ;;  %355 = vrot.lane.b32.xlu0 %v354_v20, %s1082_s1  ;;  %v1346_v20 = vstv %s1010_s13 }
  0x53   :  { %418 = vrot.lane.b32.xlu1 %v417_v29, %s1082_s1  ;;  %397 = vrot.lane.b32.xlu0 %v396_v30, %s1082_s1  ;;  %v1364_v30 = vstv %s1013_s21 }
  0x57   :  { %452 = vrot.lane.b32.xlu1 %v451_v39, %s1082_s1  ;;  %439 = vrot.lane.b32.xlu0 %v438_v40, %s1082_s1 }
  0x5b   :  { %497 = vrot.lane.b32.xlu1 %v496_v49, %s1082_s1  ;;  %476 = vrot.lane.b32.xlu0 %v475_v50, %s1082_s1 }
  0x5f   :  { %539 = vrot.lane.b32.xlu1 %v538_v57, %s1082_s1  ;;  %518 = vrot.lane.b32.xlu0 %v517_v58, %s1082_s1 }
  0x63   :  { %581 = vrot.lane.b32.xlu1 %v580_v4, %s1082_s1  ;;  %560 = vrot.lane.b32.xlu0 %v559_v63, %s1082_s1 }
  0x67   :  { %623 = vrot.lane.b32.xlu1 %v622_v6, %s1082_s1  ;;  %602 = vrot.lane.b32.xlu0 %v601_v7, %s1082_s1 }
  0x6b   :  { %636 = vrot.lane.b32.xlu0 %v635_v9, %s1082_s1 }
  0xa9   :  { %v151_v10 = vpop.permute.xlu1 %150  ;;  %v110_v11 = vpop.permute.xlu0 %109 }
  0xaa   :  { %v686_v28 = vmul.f32 %v1342_v16, %v151_v10  ;;  %v791_v29 = vmul.f32 %v1344_v17, %v151_v10  ;;  %v895_v32 = vmul.f32 %v1346_v20, %v151_v10  ;;  %v684_v33 = vmul.f32 %v1342_v16, %v110_v11 }
  0xab   :  { %v789_v34 = vmul.f32 %v1344_v17, %v110_v11  ;;  %v893_v35 = vmul.f32 %v1346_v20, %v110_v11 }
  0xad   :  { %v172_v12 = vpop.permute.xlu1 %171  ;;  %v130_v13 = vpop.permute.xlu0 %129 }
  0xae   :  { %v687_v38 = vmul.f32 %v1342_v16, %v172_v12  ;;  %v792_v39 = vmul.f32 %v1344_v17, %v172_v12  ;;  %v896_v40 = vmul.f32 %v1346_v20, %v172_v12  ;;  %v685_v41 = vmul.f32 %v1342_v16, %v130_v13 }
  0xaf   :  { %v790_v42 = vmul.f32 %v1344_v17, %v130_v13  ;;  %v894_v43 = vmul.f32 %v1346_v20, %v130_v13 }
  0xb1   :  { %v214_v14 = vpop.permute.xlu1 %213  ;;  %v193_v15 = vpop.permute.xlu0 %192 }
  0xb2   :  { %v689_v44 = vmul.f32 %v1342_v16, %v214_v14  ;;  %v1380_v45 = vmul.f32 %v1344_v17, %v214_v14  ;;  %v1383_v46 = vmul.f32 %v1346_v20, %v214_v14  ;;  %v688_v47 = vmul.f32 %v1342_v16, %v193_v15 }
  0xb3   :  { %v793_v50 = vmul.f32 %v1344_v17, %v193_v15  ;;  %v897_v56 = vmul.f32 %v1346_v20, %v193_v15 }
  0xb5   :  { %v256_v0 = vpop.permute.xlu1 %255  ;;  %v235_v2 = vpop.permute.xlu0 %234 }
  0xb6   :  { %v1394_v57 = vmul.f32 %v1342_v16, %v256_v0  ;;  %v1397_v58 = vmul.f32 %v1344_v17, %v256_v0  ;;  %v1401_v60 = vmul.f32 %v1346_v20, %v256_v0  ;;  %v690_v61 = vmul.f32 %v1342_v16, %v235_v2 }
  0xb7   :  { %v795_v63 = vmul.f32 %v1344_v17, %v235_v2  ;;  %v899_v1 = vmul.f32 %v1346_v20, %v235_v2 }
  0xb9   :  { %v293_v18 = vpop.permute.xlu1 %292  ;;  %v269_v19 = vpop.permute.xlu0 %268 }
  0xba   :  { %273 = vst [vmem:[#allocation15 + $0x80] sm:$0xff] %v269_v19  ;;  %v694_v48 = vmul.f32 %v1348_v21, %v293_v18  ;;  %v799_v49 = vmul.f32 %v1350_v22, %v293_v18  ;;  %v903_v51 = vmul.f32 %v1352_v23, %v293_v18 }
  0xbc   :  { %v703_v3 = vadd.f32 %v694_v48, %v684_v33  ;;  %v808_v5 = vadd.f32 %v799_v49, %v789_v34  ;;  %v1408_v6 = vadd.f32 %v903_v51, %v893_v35 }
  0xbd   :  { %v335_v36 = vpop.permute.xlu1 %334  ;;  %v314_v37 = vpop.permute.xlu0 %313 }
  0xbe   :  { %v696_v52 = vmul.f32 %v1348_v21, %v335_v36  ;;  %v801_v53 = vmul.f32 %v1350_v22, %v335_v36  ;;  %v905_v59 = vmul.f32 %v1352_v23, %v335_v36  ;;  %v695_v62 = vmul.f32 %v1348_v21, %v314_v37 }
  0xbf   :  { %v800_v4 = vmul.f32 %v1350_v22, %v314_v37  ;;  %v904_v9 = vmul.f32 %v1352_v23, %v314_v37 }
  0xc0   :  { %v1410_v7 = vadd.f32 %v696_v52, %v686_v28  ;;  %v1412_v8 = vadd.f32 %v801_v53, %v791_v29  ;;  %v1415_v13 = vadd.f32 %v905_v59, %v895_v32  ;;  %v704_v2 = vadd.f32 %v695_v62, %v685_v41 }
  0xc1   :  { %v377_v54 = vpop.permute.xlu1 %376  ;;  %v356_v55 = vpop.permute.xlu0 %355  ;;  %v662_v12 = vld [vmem:[#allocation15 + $0x80] sm:$0x3]  ;;  %v809_v18 = vadd.f32 %v800_v4, %v790_v42  ;;  %v913_v37 = vadd.f32 %v904_v9, %v894_v43 }
  0xc2   :  { %v698_v14 = vmul.f32 %v1348_v21, %v377_v54  ;;  %v803_v15 = vmul.f32 %v1350_v22, %v377_v54  ;;  %v907_v0 = vmul.f32 %v1352_v23, %v377_v54  ;;  %v697_v19 = vmul.f32 %v1348_v21, %v356_v55 }
  0xc3   :  { %v802_v28 = vmul.f32 %v1350_v22, %v356_v55  ;;  %v906_v29 = vmul.f32 %v1352_v23, %v356_v55  ;;  %v692_v35 = vmul.f32 %v1342_v16, %v662_v12  ;;  %v797_v36 = vmul.f32 %v1344_v17, %v662_v12 }
  0xc4   :  { %v1430_v49 = vmul.f32 %v1346_v20, %v662_v12  ;;  %v1432_v51 = vadd.f32 %v698_v14, %v688_v47  ;;  %v1434_v52 = vadd.f32 %v803_v15, %v793_v50  ;;  %v1436_v53 = vadd.f32 %v907_v0, %v897_v56 }
  0xc5   :  { %v419_v10 = vpop.permute.xlu1 %418  ;;  %v398_v11 = vpop.permute.xlu0 %397  ;;  %v706_v54 = vadd.f32 %v697_v19, %v687_v38  ;;  %v811_v55 = vadd.f32 %v802_v28, %v792_v39  ;;  %v1440_v43 = vadd.f32 %v906_v29, %v896_v40 }
  0xc6   :  { %v700_v33 = vmul.f32 %v1348_v21, %v419_v10  ;;  %v805_v34 = vmul.f32 %v1350_v22, %v419_v10  ;;  %v909_v32 = vmul.f32 %v1352_v23, %v419_v10  ;;  %v699_v41 = vmul.f32 %v1348_v21, %v398_v11 }
  0xc7   :  { %v804_v16 = vmul.f32 %v1350_v22, %v398_v11  ;;  %v908_v17 = vmul.f32 %v1352_v23, %v398_v11 }
  0xc8   :  { %v1442_v59 = vadd.f32 %v700_v33, %v690_v61  ;;  %v1444_v62 = vadd.f32 %v805_v34, %v795_v63  ;;  %v1446_v20 = vadd.f32 %v909_v32, %v899_v1  ;;  %v1448_v47 = vadd.f32 %v699_v41, %v689_v44 }
  0xc9   :  { %v453_v42 = vpop.permute.xlu1 %452  ;;  %v440_v48 = vpop.permute.xlu0 %439  ;;  %v1458_v1 = vadd.f32 %v804_v16, %v1380_v45  ;;  %v1461_v44 = vadd.f32 %v908_v17, %v1383_v46 }
  0xca   :  { %457 = vst [vmem:[#allocation15 + $0xb8] sm:$0xff] %v453_v42  ;;  %v701_v50 = vmul.f32 %v1348_v21, %v440_v48  ;;  %v806_v56 = vmul.f32 %v1350_v22, %v440_v48  ;;  %v910_v38 = vmul.f32 %v1352_v23, %v440_v48 }
  0xcc   :  { %v1466_v28 = vadd.f32 %v701_v50, %v1394_v57  ;;  %v1469_v29 = vadd.f32 %v806_v56, %v1397_v58  ;;  %v1472_v45 = vadd.f32 %v910_v38, %v1401_v60 }
  0xcd   :  { %v498_v39 = vpop.permute.xlu1 %497  ;;  %v477_v4 = vpop.permute.xlu0 %476 }
  0xce   :  { %v714_v9 = vmul.f32 %v1354_v24, %v498_v39  ;;  %v819_v40 = vmul.f32 %v1358_v26, %v498_v39  ;;  %v923_v61 = vmul.f32 %v1360_v27, %v498_v39  ;;  %v713_v63 = vmul.f32 %v1354_v24, %v477_v4 }
  0xcf   :  { %v818_v10 = vmul.f32 %v1358_v26, %v477_v4  ;;  %v922_v11 = vmul.f32 %v1360_v27, %v477_v4 }
  0xd0   :  { %v723_v12 = vadd.f32 %v714_v9, %v704_v2  ;;  %v828_v14 = vadd.f32 %v819_v40, %v809_v18  ;;  %v932_v15 = vadd.f32 %v923_v61, %v913_v37  ;;  %v722_v0 = vadd.f32 %v713_v63, %v703_v3 }
  0xd1   :  { %v672_v19 = vld [vmem:[#allocation15 + $0xb8] sm:$0x3]  ;;  %v827_v46 = vadd.f32 %v818_v10, %v808_v5  ;;  %v540_v33 = vpop.permute.xlu1 %539  ;;  %v519_v34 = vpop.permute.xlu0 %518  ;;  %v931_v18 = vadd.f32 %v922_v11, %v1408_v6 }
  0xd2   :  { %v702_v32 = vmul.f32 %v1348_v21, %v672_v19  ;;  %v807_v2 = vmul.f32 %v1350_v22, %v672_v19  ;;  %v733_v3 = vadd.f32 %v1356_v25, %v723_v12  ;;  %v838_v57 = vadd.f32 %v1364_v30, %v828_v14 }
  0xd3   :  { %v942_v58 = vadd.f32 %v1366_v31, %v932_v15  ;;  %v732_v37 = vadd.f32 %v1356_v25, %v722_v0  ;;  %v837_v60 = vadd.f32 %v1364_v30, %v827_v46  ;;  %v1487_v21 = vmul.f32 %v1352_v23, %v672_v19 }
  0xd4   :  { %v1482_v41 = vadd.f32 %v702_v32, %v692_v35  ;;  %v1484_v5 = vadd.f32 %v807_v2, %v797_v36  ;;  %v742_v22 = vmax.f32 %v733_v3, 0.0  ;;  %v847_v42 = vmax.f32 %v838_v57, 0.0 }
  0xd5   :  { %v951_v48 = vmax.f32 %v942_v58, 0.0  ;;  %v741_v16 = vmax.f32 %v732_v37, 0.0  ;;  %v846_v6 = vmax.f32 %v837_v60, 0.0  ;;  %v1489_v17 = vpop.permute.xlu1 %581  ;;  %v1491_v50 = vpop.permute.xlu0 %560  ;;  %v941_v38 = vadd.f32 %v1366_v31, %v931_v18 }
  0xd6   :  { %v751_v56 = vmin.f32 %v742_v22, 6.0  ;;  %v716_v35 = vmul.f32 %v1354_v24, %v540_v33  ;;  %v821_v36 = vmul.f32 %v1358_v26, %v540_v33  ;;  %v856_v39 = vmin.f32 %v847_v42, 6.0 }
  0xd7   :  { %v960_v4 = vmin.f32 %v951_v48, 6.0  ;;  %v750_v23 = vmin.f32 %v741_v16, 6.0  ;;  %v855_v9 = vmin.f32 %v846_v6, 6.0  ;;  %v950_v61 = vmax.f32 %v941_v38, 0.0 }
  0xd8   :  { %v760_v40 = vmul.f32 %v751_v56, %v733_v3  ;;  %v725_v63 = vadd.f32 %v716_v35, %v706_v54  ;;  %v830_v10 = vadd.f32 %v821_v36, %v811_v55  ;;  %v865_v11 = vmul.f32 %v856_v39, %v838_v57 }
  0xd9   :  { %v969_v12 = vmul.f32 %v960_v4, %v942_v58  ;;  %v759_v14 = vmul.f32 %v750_v23, %v732_v37  ;;  %v864_v15 = vmul.f32 %v855_v9, %v837_v60  ;;  %v1496_v0 = vpop.permute.xlu1 %623  ;;  %v1498_v19 = vpop.permute.xlu0 %602  ;;  %v959_v32 = vmin.f32 %v950_v61, 6.0 }
  0xda   :  { %v769_v46 = vmul.f32 0.16666667, %v760_v40  ;;  %v735_v2 = vadd.f32 %v1356_v25, %v725_v63  ;;  %v840_v18 = vadd.f32 %v1364_v30, %v830_v10  ;;  %v874_v22 = vmul.f32 0.16666667, %v865_v11 }
  0xdb   :  { %v978_v42 = vmul.f32 0.16666667, %v969_v12  ;;  %v768_v3 = vmul.f32 0.16666667, %v759_v14  ;;  %v925_v54 = vmul.f32 %v1360_v27, %v540_v33  ;;  %v873_v55 = vmul.f32 0.16666667, %v864_v15 }
  0xdc   :  { %779 = vst.msk [vmem:[%s1681_s4 + $0x8] sm:$0xff] %vm777_vm3, %v769_v46  ;;  %v968_v57 = vmul.f32 %v959_v32, %v941_v38  ;;  %v744_v58 = vmax.f32 %v735_v2, 0.0  ;;  %v849_v37 = vmax.f32 %v840_v18, 0.0  ;;  %1016 = vst.msk [vmem:[%s1681_s4 + $0x50] sm:$0xff] %vm777_vm3, %v874_v22  ;;  %v715_v60 = vmul.f32 %v1354_v24, %v519_v34 }
  0xdd   :  { %1025 = vst.msk [vmem:[%s1681_s4 + $0x98] sm:$0xff] %vm777_vm3, %v978_v42  ;;  %778 = vst.msk [vmem:[%s1681_s4] sm:$0xff] %vm777_vm3, %v768_v3  ;;  %v934_v33 = vadd.f32 %v925_v54, %v1440_v43  ;;  %v820_v48 = vmul.f32 %v1358_v26, %v519_v34  ;;  %v924_v16 = vmul.f32 %v1360_v27, %v519_v34  ;;  %v637_v6 = vpop.permute.xlu0 %636 }
  0xde   :  { %1015 = vst.msk [vmem:[%s1681_s4 + $0x48] sm:$0xff] %vm777_vm3, %v873_v55  ;;  %v977_v56 = vmul.f32 0.16666667, %v968_v57  ;;  %v753_v38 = vmin.f32 %v744_v58, 6.0  ;;  %v858_v35 = vmin.f32 %v849_v37, 6.0  ;;  %v718_v36 = vmul.f32 %v1354_v24, %v1489_v17  ;;  %641 = vst [vmem:[#allocation15 + $0x68] sm:$0xff] %v637_v6 }
  0xdf   :  { %v944_v43 = vadd.f32 %v1366_v31, %v934_v33  ;;  %v724_v39 = vadd.f32 %v715_v60, %v1410_v7  ;;  %v829_v4 = vadd.f32 %v820_v48, %v1412_v8  ;;  %v933_v34 = vadd.f32 %v924_v16, %v1415_v13 }
  0xe0   :  { %1024 = vst.msk [vmem:[%s1681_s4 + $0x90] sm:$0xff] %vm777_vm3, %v977_v56  ;;  %v762_v23 = vmul.f32 %v753_v38, %v735_v2  ;;  %v867_v9 = vmul.f32 %v858_v35, %v840_v18  ;;  %v727_v40 = vadd.f32 %v718_v36, %v1448_v47  ;;  %v823_v61 = vmul.f32 %v1358_v26, %v1489_v17 }
  0xe1   :  { %v953_v63 = vmax.f32 %v944_v43, 0.0  ;;  %v734_v10 = vadd.f32 %v1356_v25, %v724_v39  ;;  %v839_v7 = vadd.f32 %v1364_v30, %v829_v4  ;;  %v943_v8 = vadd.f32 %v1366_v31, %v933_v34 }
  0xe2   :  { %v771_v13 = vmul.f32 0.16666667, %v762_v23  ;;  %v876_v11 = vmul.f32 0.16666667, %v867_v9  ;;  %v737_v12 = vadd.f32 %v1356_v25, %v727_v40  ;;  %v832_v14 = vadd.f32 %v823_v61, %v1458_v1 }
  0xe3   :  { %v962_v15 = vmin.f32 %v953_v63, 6.0  ;;  %v743_v46 = vmax.f32 %v734_v10, 0.0  ;;  %v848_v32 = vmax.f32 %v839_v7, 0.0  ;;  %v952_v47 = vmax.f32 %v943_v8, 0.0 }
  0xe4   :  { %781 = vst.msk [vmem:[%s1681_s4 + $0x18] sm:$0xff] %vm777_vm3, %v771_v13  ;;  %1018 = vst.msk [vmem:[%s1681_s4 + $0x60] sm:$0xff] %vm777_vm3, %v876_v11  ;;  %v746_v2 = vmax.f32 %v737_v12, 0.0  ;;  %v842_v18 = vadd.f32 %v1364_v30, %v832_v14  ;;  %v927_v1 = vmul.f32 %v1360_v27, %v1489_v17  ;;  %v717_v22 = vmul.f32 %v1354_v24, %v1491_v50 }
  0xe5   :  { %v971_v42 = vmul.f32 %v962_v15, %v944_v43  ;;  %v752_v3 = vmin.f32 %v743_v46, 6.0  ;;  %v857_v54 = vmin.f32 %v848_v32, 6.0  ;;  %v961_v55 = vmin.f32 %v952_v47, 6.0 }
  0xe6   :  { %v755_v57 = vmin.f32 %v746_v2, 6.0  ;;  %v851_v58 = vmax.f32 %v842_v18, 0.0  ;;  %v936_v37 = vadd.f32 %v927_v1, %v1461_v44  ;;  %v726_v33 = vadd.f32 %v717_v22, %v1432_v51 }
  0xe7   :  { %v980_v60 = vmul.f32 0.16666667, %v971_v42  ;;  %v761_v48 = vmul.f32 %v752_v3, %v734_v10  ;;  %v866_v16 = vmul.f32 %v857_v54, %v839_v7  ;;  %v970_v6 = vmul.f32 %v961_v55, %v943_v8 }
  0xe8   :  { %v764_v56 = vmul.f32 %v755_v57, %v737_v12  ;;  %v860_v38 = vmin.f32 %v851_v58, 6.0  ;;  %v946_v17 = vadd.f32 %v1366_v31, %v936_v37  ;;  %v736_v35 = vadd.f32 %v1356_v25, %v726_v33 }
  0xe9   :  { %1027 = vst.msk [vmem:[%s1681_s4 + $0xa8] sm:$0xff] %vm777_vm3, %v980_v60  ;;  %v770_v36 = vmul.f32 0.16666667, %v761_v48  ;;  %v875_v43 = vmul.f32 0.16666667, %v866_v16  ;;  %v822_v51 = vmul.f32 %v1358_v26, %v1491_v50  ;;  %v926_v40 = vmul.f32 %v1360_v27, %v1491_v50 }
  0xea   :  { %v979_v44 = vmul.f32 0.16666667, %v970_v6  ;;  %v773_v39 = vmul.f32 0.16666667, %v764_v56  ;;  %v869_v4 = vmul.f32 %v860_v38, %v842_v18  ;;  %v955_v34 = vmax.f32 %v946_v17, 0.0 }
  0xeb   :  { %v745_v23 = vmax.f32 %v736_v35, 0.0  ;;  %780 = vst.msk [vmem:[%s1681_s4 + $0x10] sm:$0xff] %vm777_vm3, %v770_v36  ;;  %1017 = vst.msk [vmem:[%s1681_s4 + $0x58] sm:$0xff] %vm777_vm3, %v875_v43  ;;  %v831_v9 = vadd.f32 %v822_v51, %v1434_v52  ;;  %v720_v61 = vmul.f32 %v1354_v24, %v1496_v0  ;;  %v825_v63 = vmul.f32 %v1358_v26, %v1496_v0  ;;  %v682_v38 = vld [vmem:[#allocation15 + $0x68] sm:$0x3] }
  0xec   :  { %1026 = vst.msk [vmem:[%s1681_s4 + $0xa0] sm:$0xff] %vm777_vm3, %v979_v44  ;;  %783 = vst.msk [vmem:[%s1681_s4 + $0x28] sm:$0xff] %vm777_vm3, %v773_v39  ;;  %v878_v10 = vmul.f32 0.16666667, %v869_v4  ;;  %v964_v7 = vmin.f32 %v955_v34, 6.0  ;;  %v929_v52 = vmul.f32 %v1360_v27, %v1496_v0  ;;  %v935_v50 = vadd.f32 %v926_v40, %v1436_v53 }
  0xed   :  { %v754_v8 = vmin.f32 %v745_v23, 6.0  ;;  %v841_v13 = vadd.f32 %v1364_v30, %v831_v9  ;;  %v729_v11 = vadd.f32 %v720_v61, %v1466_v28  ;;  %v834_v12 = vadd.f32 %v825_v63, %v1469_v29 }
  0xee   :  { %1020 = vst.msk [vmem:[%s1681_s4 + $0x70] sm:$0xff] %vm777_vm3, %v878_v10  ;;  %v973_v14 = vmul.f32 %v964_v7, %v946_v17  ;;  %v938_v46 = vadd.f32 %v929_v52, %v1472_v45  ;;  %v719_v0 = vmul.f32 %v1354_v24, %v1498_v19  ;;  %v945_v47 = vadd.f32 %v1366_v31, %v935_v50 }
  0xef   :  { %v763_v15 = vmul.f32 %v754_v8, %v736_v35  ;;  %v850_v32 = vmax.f32 %v841_v13, 0.0  ;;  %v739_v53 = vadd.f32 %v1356_v25, %v729_v11  ;;  %v844_v28 = vadd.f32 %v1364_v30, %v834_v12 }
  0xf0   :  { %v982_v29 = vmul.f32 0.16666667, %v973_v14  ;;  %v948_v18 = vadd.f32 %v1366_v31, %v938_v46  ;;  %v728_v1 = vadd.f32 %v719_v0, %v1442_v59  ;;  %v954_v42 = vmax.f32 %v945_v47, 0.0 }
  0xf1   :  { %v772_v2 = vmul.f32 0.16666667, %v763_v15  ;;  %v859_v22 = vmin.f32 %v850_v32, 6.0  ;;  %v748_v3 = vmax.f32 %v739_v53, 0.0  ;;  %v853_v45 = vmax.f32 %v844_v28, 0.0 }
  0xf2   :  { %1029 = vst.msk [vmem:[%s1681_s4 + $0xb8] sm:$0xff] %vm777_vm3, %v982_v29  ;;  %v957_v54 = vmax.f32 %v948_v18, 0.0  ;;  %v738_v55 = vadd.f32 %v1356_v25, %v728_v1  ;;  %v824_v59 = vmul.f32 %v1358_v26, %v1498_v19  ;;  %v928_v57 = vmul.f32 %v1360_v27, %v1498_v19 }
  0xf3   :  { %782 = vst.msk [vmem:[%s1681_s4 + $0x20] sm:$0xff] %vm777_vm3, %v772_v2  ;;  %v868_v58 = vmul.f32 %v859_v22, %v841_v13  ;;  %v963_v37 = vmin.f32 %v954_v42, 6.0  ;;  %v757_v33 = vmin.f32 %v748_v3, 6.0  ;;  %v862_v60 = vmin.f32 %v853_v45, 6.0 }
  0xf4   :  { %v966_v48 = vmin.f32 %v957_v54, 6.0  ;;  %v747_v16 = vmax.f32 %v738_v55, 0.0  ;;  %v833_v6 = vadd.f32 %v824_v59, %v1444_v62  ;;  %v937_v56 = vadd.f32 %v928_v57, %v1446_v20 }
  0xf5   :  { %v877_v17 = vmul.f32 0.16666667, %v868_v58  ;;  %v972_v35 = vmul.f32 %v963_v37, %v945_v47  ;;  %v766_v36 = vmul.f32 %v757_v33, %v739_v53  ;;  %v871_v43 = vmul.f32 %v862_v60, %v844_v28 }
  0xf6   :  { %v975_v44 = vmul.f32 %v966_v48, %v948_v18  ;;  %v756_v51 = vmin.f32 %v747_v16, 6.0  ;;  %v843_v39 = vadd.f32 %v1364_v30, %v833_v6  ;;  %v947_v19 = vadd.f32 %v1366_v31, %v937_v56 }
  0xf7   :  { %1019 = vst.msk [vmem:[%s1681_s4 + $0x68] sm:$0xff] %vm777_vm3, %v877_v17  ;;  %v981_v4 = vmul.f32 0.16666667, %v972_v35  ;;  %v775_v62 = vmul.f32 0.16666667, %v766_v36  ;;  %v721_v20 = vmul.f32 %v1354_v24, %v682_v38  ;;  %v920_v63 = vadd.f32 %v1487_v21, %v1430_v49 }
  0xf8   :  { %v880_v34 = vmul.f32 0.16666667, %v871_v43  ;;  %v984_v23 = vmul.f32 0.16666667, %v975_v44  ;;  %v765_v9 = vmul.f32 %v756_v51, %v738_v55  ;;  %v852_v40 = vmax.f32 %v843_v39, 0.0 }
  0xf9   :  { %v956_v61 = vmax.f32 %v947_v19, 0.0  ;;  %1028 = vst.msk [vmem:[%s1681_s4 + $0xb0] sm:$0xff] %vm777_vm3, %v981_v4  ;;  %785 = vst.msk [vmem:[%s1681_s4 + $0x38] sm:$0xff] %vm777_vm3, %v775_v62  ;;  %v730_v24 = vadd.f32 %v721_v20, %v1482_v41  ;;  %v826_v10 = vmul.f32 %v1358_v26, %v682_v38  ;;  %v930_v49 = vmul.f32 %v1360_v27, %v682_v38 }
  0xfa   :  { %1022 = vst.msk [vmem:[%s1681_s4 + $0x80] sm:$0xff] %vm777_vm3, %v880_v34  ;;  %1031 = vst.msk [vmem:[%s1681_s4 + $0xc8] sm:$0xff] %vm777_vm3, %v984_v23  ;;  %v774_v21 = vmul.f32 0.16666667, %v765_v9  ;;  %v861_v7 = vmin.f32 %v852_v40, 6.0 }
  0xfb   :  { %v965_v8 = vmin.f32 %v956_v61, 6.0  ;;  %v740_v52 = vadd.f32 %v1356_v25, %v730_v24  ;;  %v835_v13 = vadd.f32 %v826_v10, %v1484_v5  ;;  %v939_v50 = vadd.f32 %v930_v49, %v920_v63 }
  0xfc   :  { %784 = vst.msk [vmem:[%s1681_s4 + $0x30] sm:$0xff] %vm777_vm3, %v774_v21  ;;  %v870_v26 = vmul.f32 %v861_v7, %v843_v39 }
  0xfd   :  { %v974_v27 = vmul.f32 %v965_v8, %v947_v19  ;;  %v749_v41 = vmax.f32 %v740_v52, 0.0  ;;  %v845_v11 = vadd.f32 %v1364_v30, %v835_v13  ;;  %v949_v12 = vadd.f32 %v1366_v31, %v939_v50 }
  0xfe   :  { %v879_v14 = vmul.f32 0.16666667, %v870_v26 }
  0xff   :  { %v983_v15 = vmul.f32 0.16666667, %v974_v27  ;;  %v758_v46 = vmin.f32 %v749_v41, 6.0  ;;  %v854_v0 = vmax.f32 %v845_v11, 0.0  ;;  %v958_v25 = vmax.f32 %v949_v12, 0.0 }
 0x100   :  { %1021 = vst.msk [vmem:[%s1681_s4 + $0x78] sm:$0xff] %vm777_vm3, %v879_v14 }
 0x101   :  { %1030 = vst.msk [vmem:[%s1681_s4 + $0xc0] sm:$0xff] %vm777_vm3, %v983_v15  ;;  %v767_v5 = vmul.f32 %v758_v46, %v740_v52  ;;  %v863_v32 = vmin.f32 %v854_v0, 6.0  ;;  %v967_v30 = vmin.f32 %v958_v25, 6.0 }
 0x103   :  { %v776_v31 = vmul.f32 0.16666667, %v767_v5  ;;  %v872_v47 = vmul.f32 %v863_v32, %v845_v11  ;;  %v976_v53 = vmul.f32 %v967_v30, %v949_v12 }
 0x105   :  { %787 = vst.msk [vmem:[%s1681_s4 + $0x40] sm:$0x3] %vm786_vm4, %v776_v31  ;;  %v881_v28 = vmul.f32 0.16666667, %v872_v47  ;;  %v985_v29 = vmul.f32 0.16666667, %v976_v53 }
 0x107   :  { %1023 = vst.msk [vmem:[%s1681_s4 + $0x88] sm:$0x3] %vm786_vm4, %v881_v28  ;;  %1032 = vst.msk [vmem:[%s1681_s4 + $0xd0] sm:$0x3] %vm786_vm4, %v985_v29 }
 0x108   :  { %1000 = vsyncpa [#allocation8], 1 }
 0x109   :  { %1001 = vsyncpa [#allocation9], 1 }
 0x10a   :  { %1002 = vsyncpa [#allocation12], 1 }

</bundles_post_ra>
